<compile_context>
chip_gen: v5e
topology: v5e:2x2
jax: 0.10.0
libtpu: 0.0.40
codegen_flags: <defaults>
</compile_context>

<pallas_src>
import functools

import numpy as np

import jax
import jax.numpy as jnp
from jax.experimental import pallas as pl
from jax.experimental.pallas import tpu as pltpu


def _round_up(x, m):
    return ((x + m - 1) // m) * m


def _ipow(x, n):
    out = x
    for _ in range(int(n) - 1):
        out = out * x
    return out


def _cos_power(sim, p):
    if p == 1:
        return sim
    if float(p).is_integer() and 1 < int(p) <= 16:
        return _ipow(sim, int(p))
    return jnp.power(sim, p)


def _euclid_power_from_sq(sq, p):
    """Return dist**p given dist**2, avoiding sqrt / pow where possible."""
    if p == 2:
        return sq
    if float(p).is_integer() and 1 <= int(p) <= 16:
        ip = int(p)
        half, rem = divmod(ip, 2)
        out = _ipow(sq, half) if half else None
        if rem:
            d = jnp.sqrt(sq)
            out = d if out is None else out * d
        return out
    return jnp.power(jnp.sqrt(sq), p)


def _contrastive_kernel(pi_ref, pj_ref, wt_ref,
                        e_row_ref, e_col_ref, lab_row_ref, lab_col_ref,
                        sq_row_ref, sq_col_ref, vld_row_ref, vld_col_ref,
                        eye_ref, out_ref,
                        acc_ps, acc_pc, acc_ns, acc_nc, *,
                        pos_margin, neg_margin, distance, distance_power,
                        avg_nonzero_only, has_padding, matmul_dtype):
    s = pl.program_id(0)          # shard (megacore-parallel on v7x)
    p = pl.program_id(1)          # position inside this shard's pair schedule
    n_steps = pl.num_programs(1)
    idx = s * n_steps + p         # flat index into the SMEM pair tables

    # Zero the per-shard partial accumulators at the start of the sweep.
    @pl.when(p == 0)
    def _init():
        acc_ps[...] = jnp.zeros_like(acc_ps)
        acc_pc[...] = jnp.zeros_like(acc_pc)
        acc_ns[...] = jnp.zeros_like(acc_ns)
        acc_nc[...] = jnp.zeros_like(acc_nc)
        out_ref[...] = jnp.zeros_like(out_ref)

    wf = wt_ref[idx].astype(jnp.float32)        # 0 (dummy) / 1 (diag) / 2 (off-diag)
    is_diag = pi_ref[idx] == pj_ref[idx]

    er = e_row_ref[...]                         # (T, F) f32
    ec = e_col_ref[...]                         # (T, F) f32
    if matmul_dtype is not None and jnp.dtype(matmul_dtype) != er.dtype:
        er_mm = er.astype(matmul_dtype)
        ec_mm = ec.astype(matmul_dtype)
    else:
        er_mm, ec_mm = er, ec

    # Gram tile: contract on the shared last (feature) dim -> (T, T) on MXU.
    sim = jax.lax.dot_general(er_mm, ec_mm, (((1,), (1,)), ((), ())),
                              preferred_element_type=jnp.float32)

    if distance == 'cosine':
        mat = _cos_power(sim, distance_power)
        pe = jnp.maximum(pos_margin - mat, 0.0)
        ne = jnp.maximum(mat - neg_margin, 0.0)
    else:  # Euclidean
        sq = jnp.maximum(sq_row_ref[...] + sq_col_ref[...] - 2.0 * sim, 0.0)
        mat = _euclid_power_from_sq(sq, distance_power)
        pe = jnp.maximum(mat - pos_margin, 0.0)
        ne = jnp.maximum(neg_margin - mat, 0.0)

    same = lab_row_ref[...] == lab_col_ref[...]           # (T, T) bool
    pos_v = jnp.where(same, pe, 0.0)
    neg_v = jnp.where(same, 0.0, ne)
    if has_padding:
        vv = vld_row_ref[...] * vld_col_ref[...]          # (T, T) {0,1}
        pos_v = pos_v * vv
        neg_v = neg_v * vv

    if avg_nonzero_only:
        p_ind = (pos_v > 0.0).astype(jnp.float32)
        n_ind = (neg_v > 0.0).astype(jnp.float32)
    else:
        p_ind = jnp.where(same, 1.0, 0.0)
        n_ind = jnp.where(same, 0.0, 1.0)
        if has_padding:
            p_ind = p_ind * vv
            n_ind = n_ind * vv

    # Sublane-direction partial sums only (no cross-lane work in the hot loop);
    # the symmetry weight is applied on the tiny (1, T) reduced rows.
    acc_ps[...] += wf * jnp.sum(pos_v, axis=0, keepdims=True)
    acc_pc[...] += wf * jnp.sum(p_ind, axis=0, keepdims=True)
    acc_ns[...] += wf * jnp.sum(neg_v, axis=0, keepdims=True)
    acc_nc[...] += wf * jnp.sum(n_ind, axis=0, keepdims=True)

    # Exact removal of the global diagonal (self pairs are never positives).
    # Only diagonal tile pairs carry the global diagonal; this is a cold path.
    @pl.when(is_diag)
    def _remove_diag():
        eye = eye_ref[...]
        acc_ps[...] -= wf * jnp.sum(pos_v * eye, axis=0, keepdims=True)
        acc_pc[...] -= wf * jnp.sum(p_ind * eye, axis=0, keepdims=True)

    # Finalize once per shard: 4 full reductions + lane-dense packing.
    @pl.when(p == n_steps - 1)
    def _finalize():
        pos_sum = jnp.sum(acc_ps[...])
        pos_cnt = jnp.sum(acc_pc[...])
        neg_sum = jnp.sum(acc_ns[...])
        neg_cnt = jnp.sum(acc_nc[...])
        sub = jax.lax.broadcasted_iota(jnp.int32, (8, 128), 0)
        lane = jax.lax.broadcasted_iota(jnp.int32, (8, 128), 1)
        row0 = sub == 0
        out_ref[...] = (jnp.where(row0 & (lane == 0), pos_sum, 0.0)
                        + jnp.where(row0 & (lane == 1), pos_cnt, 0.0)
                        + jnp.where(row0 & (lane == 2), neg_sum, 0.0)
                        + jnp.where(row0 & (lane == 3), neg_cnt, 0.0))


def contrastive_loss(embeds, labels, *,
                     pos_margin=0.0, neg_margin=0.5,
                     distance='Euclidean', distance_power=1,
                     avg_nonzero_only=True, normalize_embeds=True,
                     tile=None, matmul_dtype=None):
    """Pallas TPU implementation of ContrastiveLoss.forward (AllPairsMiner)."""
    assert distance in ('cosine', 'Euclidean')
    B, F = embeds.shape

    e = embeds.astype(jnp.float32)
    if normalize_embeds or distance == 'cosine':
        # Hoisted out of the kernel's hot loop.
        # F.normalize(p=2, dim=1, eps=1e-12) == x * rsqrt(max(sum(x^2), eps^2))
        sumsq = jnp.sum(e * e, axis=1, keepdims=True)
        e = e * jax.lax.rsqrt(jnp.maximum(sumsq, 1e-24))
    labels = labels.astype(jnp.int32)

    # --- tiling (square tiles: rows and cols share the tile size) ------------
    if tile is None:
        if B <= 128:
            tile = _round_up(B, 8)
        elif B >= 512 and F <= 2048:
            tile = 256          # fills the 256-wide MXU on v6e/v7x
        else:
            tile = 128
    tile = int(tile)
    if tile >= B:
        tile = _round_up(B, 8)  # single tile pair
    else:
        assert tile % 128 == 0, (
            "tile must be a multiple of 128 (lane constraint) unless it "
            "covers the whole batch")
    Bp = _round_up(B, tile)
    n_t = Bp // tile
    has_padding = (Bp != B)

    # --- padded operands (single padded copy of the embeddings) --------------
    if not has_padding:
        e_pad = e
        lab_pad = labels
    else:
        e_pad = jnp.zeros((Bp, F), jnp.float32).at[:B].set(e)
        lab_pad = jnp.zeros((Bp,), jnp.int32).at[:B].set(labels)
    lab_row = lab_pad.reshape(Bp, 1)
    lab_col = lab_pad.reshape(1, Bp)
    sq = jnp.sum(e_pad * e_pad, axis=1)
    sq_row = sq.reshape(Bp, 1)          # precomputed row norms (review item)
    sq_col = sq.reshape(1, Bp)
    valid = (jnp.arange(Bp) < B).astype(jnp.float32)
    vld_row = valid.reshape(Bp, 1)
    vld_col = valid.reshape(1, Bp)
    eye = jnp.eye(tile, dtype=jnp.float32)

    # --- upper-triangular tile-pair schedule (symmetry: ~2x fewer steps) -----
    pairs = [(i, j) for i in range(n_t) for j in range(i, n_t)]
    n_pairs = len(pairs)
    n_shards = 2 if n_pairs >= 2 else 1           # keep both v7x cores busy
    steps = -(-n_pairs // n_shards)
    pi_tab = np.zeros((n_shards * steps,), np.int32)
    pj_tab = np.zeros((n_shards * steps,), np.int32)
    wt_tab = np.zeros((n_shards * steps,), np.int32)   # 0 dummy / 1 diag / 2 off-diag
    for k, (i, j) in enumerate(pairs):
        pi_tab[k], pj_tab[k] = i, j
        wt_tab[k] = 1 if i == j else 2
    pi_tab = jnp.asarray(pi_tab)
    pj_tab = jnp.asarray(pj_tab)
    wt_tab = jnp.asarray(wt_tab)

    T = tile

    def _row_map(s, p, pi, pj, wt):
        return (pi[s * steps + p], 0)

    def _colrow_map(s, p, pi, pj, wt):
        return (pj[s * steps + p], 0)

    def _col_map(s, p, pi, pj, wt):
        return (0, pj[s * steps + p])

    kernel = functools.partial(
        _contrastive_kernel,
        pos_margin=float(pos_margin), neg_margin=float(neg_margin),
        distance=distance, distance_power=distance_power,
        avg_nonzero_only=bool(avg_nonzero_only),
        has_padding=has_padding, matmul_dtype=matmul_dtype)

    grid_spec = pltpu.PrefetchScalarGridSpec(
        num_scalar_prefetch=3,
        grid=(n_shards, steps),
        in_specs=[
            pl.BlockSpec((T, F), _row_map),      # row embeds
            pl.BlockSpec((T, F), _colrow_map),   # col embeds (same HBM array)
            pl.BlockSpec((T, 1), _row_map),      # row labels
            pl.BlockSpec((1, T), _col_map),      # col labels
            pl.BlockSpec((T, 1), _row_map),      # row sq-norms
            pl.BlockSpec((1, T), _col_map),      # col sq-norms
            pl.BlockSpec((T, 1), _row_map),      # row validity
            pl.BlockSpec((1, T), _col_map),      # col validity
            pl.BlockSpec((T, T), lambda s, p, pi, pj, wt: (0, 0)),  # identity tile
        ],
        out_specs=pl.BlockSpec((8, 128), lambda s, p, pi, pj, wt: (s, 0)),
        scratch_shapes=[pltpu.VMEM((1, T), jnp.float32)] * 4,
    )

    partials = pl.pallas_call(
        kernel,
        out_shape=jax.ShapeDtypeStruct((n_shards * 8, 128), jnp.float32),
        grid_spec=grid_spec,
        compiler_params=pltpu.CompilerParams(
            dimension_semantics=("parallel", "arbitrary")),
    )(pi_tab, pj_tab, wt_tab,
      e_pad, e_pad, lab_row, lab_col, sq_row, sq_col, vld_row, vld_col, eye)

    # TODO(synk): final reduction is f32; counts lose +/-1 exactness beyond
    # 2^24 pairs (B in the several-thousand range with dense positives).
    totals = jnp.sum(partials, axis=0)
    pos_sum, pos_cnt = totals[0], totals[1]
    neg_sum, neg_cnt = totals[2], totals[3]

    if avg_nonzero_only:
        pos_loss = pos_sum / (pos_cnt + 1e-12)
        neg_loss = neg_sum / (neg_cnt + 1e-12)
        return pos_loss + neg_loss
    # torch early-returns 0 only when *both* mined sets are empty; a single
    # empty set keeps torch's NaN (.mean() of an empty tensor) semantics.
    loss = pos_sum / pos_cnt + neg_sum / neg_cnt
    return jnp.where((pos_cnt + neg_cnt) == 0, jnp.float32(0.0), loss)


def _reference_loss(embeds, labels, *, pos_margin=0.0, neg_margin=0.5,
                    distance='Euclidean', distance_power=1,
                    avg_nonzero_only=True, normalize_embeds=True):
    e = embeds.astype(jnp.float32)
    if normalize_embeds or distance == 'cosine':
        e = e / jnp.maximum(jnp.linalg.norm(e, axis=1, keepdims=True), 1e-12)
    B = e.shape[0]
    same = labels[:, None] == labels[None, :]
    eye = jnp.eye(B, dtype=bool)
    pos_mask = same & (~eye)
    neg_mask = ~same
    if distance == 'cosine':
        mat = e @ e.T
        if distance_power != 1:
            mat = mat ** distance_power
        pos_elem = jnp.maximum(pos_margin - mat, 0.0)
        neg_elem = jnp.maximum(mat - neg_margin, 0.0)
    else:
        diff = e[:, None, :] - e[None, :, :]
        dist = jnp.sqrt(jnp.sum(diff * diff, axis=-1))
        if distance_power != 1:
            dist = dist ** distance_power
        pos_elem = jnp.maximum(dist - pos_margin, 0.0)
        neg_elem = jnp.maximum(neg_margin - dist, 0.0)
    pos_vals = jnp.where(pos_mask, pos_elem, 0.0)
    neg_vals = jnp.where(neg_mask, neg_elem, 0.0)
    if avg_nonzero_only:
        pos_loss = pos_vals.sum() / ((pos_vals > 0).sum().astype(jnp.float32) + 1e-12)
        neg_loss = neg_vals.sum() / ((neg_vals > 0).sum().astype(jnp.float32) + 1e-12)
    else:
        pos_loss = pos_vals.sum() / pos_mask.sum().astype(jnp.float32)
        neg_loss = neg_vals.sum() / neg_mask.sum().astype(jnp.float32)
    return pos_loss + neg_loss


if __name__ == "__main__":
    key = jax.random.PRNGKey(0)
    k_e, k_l, k_e2, k_l2 = jax.random.split(key, 4)

    # 1) Small default-config check: batch=8, features=32, 4 classes
    #    (single tile pair, diagonal correction path).
    B, F, C = 8, 32, 4
    embeds = jax.random.normal(k_e, (B, F), dtype=jnp.float32)
    labels = jax.random.randint(k_l, (B,), 0, C, dtype=jnp.int32)
    loss = jax.block_until_ready(contrastive_loss(embeds, labels))
    ref = _reference_loss(embeds, labels)
    assert jnp.allclose(loss, ref, rtol=1e-4, atol=1e-5), (loss, ref)

    # 2) Multi-tile: padding validity, symmetric 2x weighting, diagonal-tile
    #    correction, dummy (weight-0) schedule entry, two shards.
    B2, F2, C2 = 160, 32, 6
    embeds2 = jax.random.normal(k_e2, (B2, F2), dtype=jnp.float32)
    labels2 = jax.random.randint(k_l2, (B2,), 0, C2, dtype=jnp.int32)
    loss2 = jax.block_until_ready(contrastive_loss(embeds2, labels2, tile=128))
    ref2 = _reference_loss(embeds2, labels2)
    assert jnp.allclose(loss2, ref2, rtol=1e-4, atol=1e-5), (loss2, ref2)

    # 3) Cosine-distance branch, multi-tile.
    loss3 = jax.block_until_ready(
        contrastive_loss(embeds2, labels2, distance='cosine',
                         pos_margin=0.9, neg_margin=0.5, tile=128))
    ref3 = _reference_loss(embeds2, labels2, distance='cosine',
                           pos_margin=0.9, neg_margin=0.5)
    assert jnp.allclose(loss3, ref3, rtol=1e-4, atol=1e-5), (loss3, ref3)

    # 4) avg_nonzero_only=False (mean over mined pairs).
    loss4 = jax.block_until_ready(
        contrastive_loss(embeds2, labels2, avg_nonzero_only=False, tile=128))
    ref4 = _reference_loss(embeds2, labels2, avg_nonzero_only=False)
    assert jnp.allclose(loss4, ref4, rtol=1e-4, atol=1e-5), (loss4, ref4)

    print("KERNEL_OK")
</pallas_src>

<mosaic_0001>
module attributes {stable_mosaic.version = 11 : i64} {
  func.func @_contrastive_kernel(%arg0: i32, %arg1: i32, %arg2: memref<1xi32, #tpu.memory_space<smem>>, %arg3: memref<1xi32, #tpu.memory_space<smem>>, %arg4: memref<1xi32, #tpu.memory_space<smem>>, %arg5: memref<8x32xf32, #tpu.memory_space<vmem>>, %arg6: memref<8x32xf32, #tpu.memory_space<vmem>>, %arg7: memref<8x1xi32, #tpu.memory_space<vmem>>, %arg8: memref<1x8xi32, #tpu.memory_space<vmem>>, %arg9: memref<8x1xf32, #tpu.memory_space<vmem>>, %arg10: memref<1x8xf32, #tpu.memory_space<vmem>>, %arg11: memref<8x1xf32, #tpu.memory_space<vmem>>, %arg12: memref<1x8xf32, #tpu.memory_space<vmem>>, %arg13: memref<8x8xf32, #tpu.memory_space<vmem>>, %arg14: memref<8x128xf32, #tpu.memory_space<vmem>>, %arg15: memref<1x8xf32, #tpu.memory_space<vmem>>, %arg16: memref<1x8xf32, #tpu.memory_space<vmem>>, %arg17: memref<1x8xf32, #tpu.memory_space<vmem>>, %arg18: memref<1x8xf32, #tpu.memory_space<vmem>>) attributes {dimension_semantics = [#tpu.dimension_semantics<parallel>, #tpu.dimension_semantics<arbitrary>], iteration_bounds = array<i64: 1, 1>, scalar_prefetch = 3 : i64, scratch_operands = 4 : i64, tpu.core_type = #tpu.core_type<tc>, window_params = [{transform_indices = @transform_0, window_bounds = array<i64: 8, 32>}, {transform_indices = @transform_1, window_bounds = array<i64: 8, 32>}, {transform_indices = @transform_2, window_bounds = array<i64: 8, 1>}, {transform_indices = @transform_3, window_bounds = array<i64: 1, 8>}, {transform_indices = @transform_4, window_bounds = array<i64: 8, 1>}, {transform_indices = @transform_5, window_bounds = array<i64: 1, 8>}, {transform_indices = @transform_6, window_bounds = array<i64: 8, 1>}, {transform_indices = @transform_7, window_bounds = array<i64: 1, 8>}, {pipeline_mode = #tpu.pipeline_mode<synchronous>, transform_indices = @transform_8, window_bounds = array<i64: 8, 8>}, {transform_indices = @transform_9, window_bounds = array<i64: 8, 128>}]} {
    %c1_i32 = arith.constant 1 : i32
    %0 = arith.muli %arg0, %c1_i32 : i32
    %1 = arith.addi %0, %arg1 : i32
    %c0_i32 = arith.constant 0 : i32
    %2 = arith.cmpi eq, %arg1, %c0_i32 : i32
    %3 = arith.extui %2 : i1 to i32
    %c0_i32_0 = arith.constant 0 : i32
    %4 = arith.cmpi ne, %3, %c0_i32_0 : i32
    scf.if %4 {
      %cst_45 = arith.constant 0.000000e+00 : f32
      %85 = vector.broadcast %cst_45 : f32 to vector<1x8xf32>
      %c0_46 = arith.constant 0 : index
      %c0_47 = arith.constant 0 : index
      %86 = vector.load %arg15[%c0_46, %c0_47] : memref<1x8xf32, #tpu.memory_space<vmem>>, vector<1x8xf32>
      tpu.vector_store %arg15[%c0_46, %c0_47], %85 {strides = array<i32>} : memref<1x8xf32, #tpu.memory_space<vmem>>, vector<1x8xf32>,
      %cst_48 = arith.constant 0.000000e+00 : f32
      %87 = vector.broadcast %cst_48 : f32 to vector<1x8xf32>
      %c0_49 = arith.constant 0 : index
      %c0_50 = arith.constant 0 : index
      %88 = vector.load %arg16[%c0_49, %c0_50] : memref<1x8xf32, #tpu.memory_space<vmem>>, vector<1x8xf32>
      tpu.vector_store %arg16[%c0_49, %c0_50], %87 {strides = array<i32>} : memref<1x8xf32, #tpu.memory_space<vmem>>, vector<1x8xf32>,
      %cst_51 = arith.constant 0.000000e+00 : f32
      %89 = vector.broadcast %cst_51 : f32 to vector<1x8xf32>
      %c0_52 = arith.constant 0 : index
      %c0_53 = arith.constant 0 : index
      %90 = vector.load %arg17[%c0_52, %c0_53] : memref<1x8xf32, #tpu.memory_space<vmem>>, vector<1x8xf32>
      tpu.vector_store %arg17[%c0_52, %c0_53], %89 {strides = array<i32>} : memref<1x8xf32, #tpu.memory_space<vmem>>, vector<1x8xf32>,
      %cst_54 = arith.constant 0.000000e+00 : f32
      %91 = vector.broadcast %cst_54 : f32 to vector<1x8xf32>
      %c0_55 = arith.constant 0 : index
      %c0_56 = arith.constant 0 : index
      %92 = vector.load %arg18[%c0_55, %c0_56] : memref<1x8xf32, #tpu.memory_space<vmem>>, vector<1x8xf32>
      tpu.vector_store %arg18[%c0_55, %c0_56], %91 {strides = array<i32>} : memref<1x8xf32, #tpu.memory_space<vmem>>, vector<1x8xf32>,
      %cst_57 = arith.constant 0.000000e+00 : f32
      %93 = vector.broadcast %cst_57 : f32 to vector<8x128xf32>
      %c0_58 = arith.constant 0 : index
      %c0_59 = arith.constant 0 : index
      %94 = vector.load %arg14[%c0_58, %c0_59] : memref<8x128xf32, #tpu.memory_space<vmem>>, vector<8x128xf32>
      tpu.vector_store %arg14[%c0_58, %c0_59], %93 {strides = array<i32>} : memref<8x128xf32, #tpu.memory_space<vmem>>, vector<8x128xf32>,
    } else {
    }
    %5 = arith.index_cast %1 : i32 to index
    %6 = memref.load %arg4[%5] : memref<1xi32, #tpu.memory_space<smem>>
    %7 = arith.sitofp %6 : i32 to f32
    %8 = arith.index_cast %1 : i32 to index
    %9 = memref.load %arg2[%8] : memref<1xi32, #tpu.memory_space<smem>>
    %10 = arith.index_cast %1 : i32 to index
    %11 = memref.load %arg3[%10] : memref<1xi32, #tpu.memory_space<smem>>
    %12 = arith.cmpi eq, %9, %11 : i32
    %c0 = arith.constant 0 : index
    %c0_1 = arith.constant 0 : index
    %13 = vector.load %arg5[%c0, %c0_1] : memref<8x32xf32, #tpu.memory_space<vmem>>, vector<8x32xf32>
    %c0_2 = arith.constant 0 : index
    %c0_3 = arith.constant 0 : index
    %14 = vector.load %arg6[%c0_2, %c0_3] : memref<8x32xf32, #tpu.memory_space<vmem>>, vector<8x32xf32>
    %cst = arith.constant dense<0.000000e+00> : vector<8x8xf32>
    %15 = tpu.matmul %13, %14, %cst {dimension_numbers = #tpu.dot_dimension_numbers<[1], [1], [0], [0], [0, 0, 1, 0], [], []>} : vector<8x32xf32>, vector<8x32xf32>, vector<8x8xf32> -> vector<8x8xf32>
    %c0_4 = arith.constant 0 : index
    %c0_5 = arith.constant 0 : index
    %16 = vector.load %arg9[%c0_4, %c0_5] : memref<8x1xf32, #tpu.memory_space<vmem>>, vector<8x1xf32>
    %c0_6 = arith.constant 0 : index
    %c0_7 = arith.constant 0 : index
    %17 = vector.load %arg10[%c0_6, %c0_7] : memref<1x8xf32, #tpu.memory_space<vmem>>, vector<1x8xf32>
    %18 = vector.broadcast %16 : vector<8x1xf32> to vector<8x8xf32>
    %19 = vector.broadcast %17 : vector<1x8xf32> to vector<8x8xf32>
    %20 = arith.addf %18, %19 : vector<8x8xf32>
    %cst_8 = arith.constant 2.000000e+00 : f32
    %21 = vector.broadcast %cst_8 : f32 to vector<8x8xf32>
    %22 = arith.mulf %21, %15 : vector<8x8xf32>
    %23 = arith.subf %20, %22 : vector<8x8xf32>
    %cst_9 = arith.constant 0.000000e+00 : f32
    %24 = vector.broadcast %cst_9 : f32 to vector<8x8xf32>
    %25 = arith.maximumf %23, %24 : vector<8x8xf32>
    %26 = math.sqrt %25 : vector<8x8xf32>
    %cst_10 = arith.constant 0.000000e+00 : f32
    %27 = vector.broadcast %cst_10 : f32 to vector<8x8xf32>
    %28 = arith.subf %26, %27 : vector<8x8xf32>
    %cst_11 = arith.constant 0.000000e+00 : f32
    %29 = vector.broadcast %cst_11 : f32 to vector<8x8xf32>
    %30 = arith.maximumf %28, %29 : vector<8x8xf32>
    %cst_12 = arith.constant 5.000000e-01 : f32
    %31 = vector.broadcast %cst_12 : f32 to vector<8x8xf32>
    %32 = arith.subf %31, %26 : vector<8x8xf32>
    %cst_13 = arith.constant 0.000000e+00 : f32
    %33 = vector.broadcast %cst_13 : f32 to vector<8x8xf32>
    %34 = arith.maximumf %32, %33 : vector<8x8xf32>
    %c0_14 = arith.constant 0 : index
    %c0_15 = arith.constant 0 : index
    %35 = vector.load %arg7[%c0_14, %c0_15] : memref<8x1xi32, #tpu.memory_space<vmem>>, vector<8x1xi32>
    %c0_16 = arith.constant 0 : index
    %c0_17 = arith.constant 0 : index
    %36 = vector.load %arg8[%c0_16, %c0_17] : memref<1x8xi32, #tpu.memory_space<vmem>>, vector<1x8xi32>
    %37 = vector.broadcast %35 : vector<8x1xi32> to vector<8x8xi32>
    %38 = vector.broadcast %36 : vector<1x8xi32> to vector<8x8xi32>
    %39 = arith.cmpi eq, %37, %38 : vector<8x8xi32>
    %cst_18 = arith.constant 0.000000e+00 : f32
    %40 = vector.broadcast %cst_18 : f32 to vector<8x8xf32>
    %41 = arith.select %39, %30, %40 : vector<8x8xi1>, vector<8x8xf32>
    %cst_19 = arith.constant 0.000000e+00 : f32
    %42 = vector.broadcast %cst_19 : f32 to vector<8x8xf32>
    %43 = arith.select %39, %42, %34 : vector<8x8xi1>, vector<8x8xf32>
    %cst_20 = arith.constant 0.000000e+00 : f32
    %44 = vector.broadcast %cst_20 : f32 to vector<8x8xf32>
    %45 = arith.cmpf ogt, %41, %44 : vector<8x8xf32>
    %46 = arith.extui %45 : vector<8x8xi1> to vector<8x8xi32>
    %47 = arith.sitofp %46 : vector<8x8xi32> to vector<8x8xf32>
    %cst_21 = arith.constant 0.000000e+00 : f32
    %48 = vector.broadcast %cst_21 : f32 to vector<8x8xf32>
    %49 = arith.cmpf ogt, %43, %48 : vector<8x8xf32>
    %50 = arith.extui %49 : vector<8x8xi1> to vector<8x8xi32>
    %51 = arith.sitofp %50 : vector<8x8xi32> to vector<8x8xf32>
    %c0_22 = arith.constant 0 : index
    %c0_23 = arith.constant 0 : index
    %52 = vector.load %arg15[%c0_22, %c0_23] : memref<1x8xf32, #tpu.memory_space<vmem>>, vector<1x8xf32>
    %cst_24 = arith.constant dense<0.000000e+00> : vector<8xf32>
    %53 = vector.multi_reduction <add>, %41, %cst_24 [0] : vector<8x8xf32> to vector<8xf32>
    %54 = vector.shape_cast %53 : vector<8xf32> to vector<1x8xf32>
    %55 = vector.broadcast %7 : f32 to vector<1x8xf32>
    %56 = arith.mulf %55, %54 : vector<1x8xf32>
    %57 = arith.addf %52, %56 : vector<1x8xf32>
    %c0_25 = arith.constant 0 : index
    %c0_26 = arith.constant 0 : index
    %58 = vector.load %arg15[%c0_25, %c0_26] : memref<1x8xf32, #tpu.memory_space<vmem>>, vector<1x8xf32>
    tpu.vector_store %arg15[%c0_25, %c0_26], %57 {strides = array<i32>} : memref<1x8xf32, #tpu.memory_space<vmem>>, vector<1x8xf32>,
    %c0_27 = arith.constant 0 : index
    %c0_28 = arith.constant 0 : index
    %59 = vector.load %arg16[%c0_27, %c0_28] : memref<1x8xf32, #tpu.memory_space<vmem>>, vector<1x8xf32>
    %cst_29 = arith.constant dense<0.000000e+00> : vector<8xf32>
    %60 = vector.multi_reduction <add>, %47, %cst_29 [0] : vector<8x8xf32> to vector<8xf32>
    %61 = vector.shape_cast %60 : vector<8xf32> to vector<1x8xf32>
    %62 = vector.broadcast %7 : f32 to vector<1x8xf32>
    %63 = arith.mulf %62, %61 : vector<1x8xf32>
    %64 = arith.addf %59, %63 : vector<1x8xf32>
    %c0_30 = arith.constant 0 : index
    %c0_31 = arith.constant 0 : index
    %65 = vector.load %arg16[%c0_30, %c0_31] : memref<1x8xf32, #tpu.memory_space<vmem>>, vector<1x8xf32>
    tpu.vector_store %arg16[%c0_30, %c0_31], %64 {strides = array<i32>} : memref<1x8xf32, #tpu.memory_space<vmem>>, vector<1x8xf32>,
    %c0_32 = arith.constant 0 : index
    %c0_33 = arith.constant 0 : index
    %66 = vector.load %arg17[%c0_32, %c0_33] : memref<1x8xf32, #tpu.memory_space<vmem>>, vector<1x8xf32>
    %cst_34 = arith.constant dense<0.000000e+00> : vector<8xf32>
    %67 = vector.multi_reduction <add>, %43, %cst_34 [0] : vector<8x8xf32> to vector<8xf32>
    %68 = vector.shape_cast %67 : vector<8xf32> to vector<1x8xf32>
    %69 = vector.broadcast %7 : f32 to vector<1x8xf32>
    %70 = arith.mulf %69, %68 : vector<1x8xf32>
    %71 = arith.addf %66, %70 : vector<1x8xf32>
    %c0_35 = arith.constant 0 : index
    %c0_36 = arith.constant 0 : index
    %72 = vector.load %arg17[%c0_35, %c0_36] : memref<1x8xf32, #tpu.memory_space<vmem>>, vector<1x8xf32>
    tpu.vector_store %arg17[%c0_35, %c0_36], %71 {strides = array<i32>} : memref<1x8xf32, #tpu.memory_space<vmem>>, vector<1x8xf32>,
    %c0_37 = arith.constant 0 : index
    %c0_38 = arith.constant 0 : index
    %73 = vector.load %arg18[%c0_37, %c0_38] : memref<1x8xf32, #tpu.memory_space<vmem>>, vector<1x8xf32>
    %cst_39 = arith.constant dense<0.000000e+00> : vector<8xf32>
    %74 = vector.multi_reduction <add>, %51, %cst_39 [0] : vector<8x8xf32> to vector<8xf32>
    %75 = vector.shape_cast %74 : vector<8xf32> to vector<1x8xf32>
    %76 = vector.broadcast %7 : f32 to vector<1x8xf32>
    %77 = arith.mulf %76, %75 : vector<1x8xf32>
    %78 = arith.addf %73, %77 : vector<1x8xf32>
    %c0_40 = arith.constant 0 : index
    %c0_41 = arith.constant 0 : index
    %79 = vector.load %arg18[%c0_40, %c0_41] : memref<1x8xf32, #tpu.memory_space<vmem>>, vector<1x8xf32>
    tpu.vector_store %arg18[%c0_40, %c0_41], %78 {strides = array<i32>} : memref<1x8xf32, #tpu.memory_space<vmem>>, vector<1x8xf32>,
    %80 = arith.extui %12 : i1 to i32
    %c0_i32_42 = arith.constant 0 : i32
    %81 = arith.cmpi ne, %80, %c0_i32_42 : i32
    scf.if %81 {
      %c0_45 = arith.constant 0 : index
      %c0_46 = arith.constant 0 : index
      %85 = vector.load %arg13[%c0_45, %c0_46] : memref<8x8xf32, #tpu.memory_space<vmem>>, vector<8x8xf32>
      %c0_47 = arith.constant 0 : index
      %c0_48 = arith.constant 0 : index
      %86 = vector.load %arg15[%c0_47, %c0_48] : memref<1x8xf32, #tpu.memory_space<vmem>>, vector<1x8xf32>
      %87 = arith.mulf %41, %85 : vector<8x8xf32>
      %cst_49 = arith.constant dense<0.000000e+00> : vector<8xf32>
      %88 = vector.multi_reduction <add>, %87, %cst_49 [0] : vector<8x8xf32> to vector<8xf32>
      %89 = vector.shape_cast %88 : vector<8xf32> to vector<1x8xf32>
      %90 = vector.broadcast %7 : f32 to vector<1x8xf32>
      %91 = arith.mulf %90, %89 : vector<1x8xf32>
      %92 = arith.subf %86, %91 : vector<1x8xf32>
      %c0_50 = arith.constant 0 : index
      %c0_51 = arith.constant 0 : index
      %93 = vector.load %arg15[%c0_50, %c0_51] : memref<1x8xf32, #tpu.memory_space<vmem>>, vector<1x8xf32>
      tpu.vector_store %arg15[%c0_50, %c0_51], %92 {strides = array<i32>} : memref<1x8xf32, #tpu.memory_space<vmem>>, vector<1x8xf32>,
      %c0_52 = arith.constant 0 : index
      %c0_53 = arith.constant 0 : index
      %94 = vector.load %arg16[%c0_52, %c0_53] : memref<1x8xf32, #tpu.memory_space<vmem>>, vector<1x8xf32>
      %95 = arith.mulf %47, %85 : vector<8x8xf32>
      %cst_54 = arith.constant dense<0.000000e+00> : vector<8xf32>
      %96 = vector.multi_reduction <add>, %95, %cst_54 [0] : vector<8x8xf32> to vector<8xf32>
      %97 = vector.shape_cast %96 : vector<8xf32> to vector<1x8xf32>
      %98 = vector.broadcast %7 : f32 to vector<1x8xf32>
      %99 = arith.mulf %98, %97 : vector<1x8xf32>
      %100 = arith.subf %94, %99 : vector<1x8xf32>
      %c0_55 = arith.constant 0 : index
      %c0_56 = arith.constant 0 : index
      %101 = vector.load %arg16[%c0_55, %c0_56] : memref<1x8xf32, #tpu.memory_space<vmem>>, vector<1x8xf32>
      tpu.vector_store %arg16[%c0_55, %c0_56], %100 {strides = array<i32>} : memref<1x8xf32, #tpu.memory_space<vmem>>, vector<1x8xf32>,
    } else {
    }
    %c0_i32_43 = arith.constant 0 : i32
    %82 = arith.cmpi eq, %arg1, %c0_i32_43 : i32
    %83 = arith.extui %82 : i1 to i32
    %c0_i32_44 = arith.constant 0 : i32
    %84 = arith.cmpi ne, %83, %c0_i32_44 : i32
    scf.if %84 {
      %c0_45 = arith.constant 0 : index
      %c0_46 = arith.constant 0 : index
      %85 = vector.load %arg15[%c0_45, %c0_46] : memref<1x8xf32, #tpu.memory_space<vmem>>, vector<1x8xf32>
      %86 = vector.shape_cast %85 : vector<1x8xf32> to vector<1x1x8xf32>
      %cst_47 = arith.constant dense<0.000000e+00> : vector<1xf32>
      %87 = vector.multi_reduction <add>, %86, %cst_47 [1, 2] : vector<1x1x8xf32> to vector<1xf32>
      %88 = vector.shape_cast %87 : vector<1xf32> to vector<1x1x1xf32>
      %89 = vector.extract %88[0, 0, 0] : f32 from vector<1x1x1xf32>
      %c0_48 = arith.constant 0 : index
      %c0_49 = arith.constant 0 : index
      %90 = vector.load %arg16[%c0_48, %c0_49] : memref<1x8xf32, #tpu.memory_space<vmem>>, vector<1x8xf32>
      %91 = vector.shape_cast %90 : vector<1x8xf32> to vector<1x1x8xf32>
      %cst_50 = arith.constant dense<0.000000e+00> : vector<1xf32>
      %92 = vector.multi_reduction <add>, %91, %cst_50 [1, 2] : vector<1x1x8xf32> to vector<1xf32>
      %93 = vector.shape_cast %92 : vector<1xf32> to vector<1x1x1xf32>
      %94 = vector.extract %93[0, 0, 0] : f32 from vector<1x1x1xf32>
      %c0_51 = arith.constant 0 : index
      %c0_52 = arith.constant 0 : index
      %95 = vector.load %arg17[%c0_51, %c0_52] : memref<1x8xf32, #tpu.memory_space<vmem>>, vector<1x8xf32>
      %96 = vector.shape_cast %95 : vector<1x8xf32> to vector<1x1x8xf32>
      %cst_53 = arith.constant dense<0.000000e+00> : vector<1xf32>
      %97 = vector.multi_reduction <add>, %96, %cst_53 [1, 2] : vector<1x1x8xf32> to vector<1xf32>
      %98 = vector.shape_cast %97 : vector<1xf32> to vector<1x1x1xf32>
      %99 = vector.extract %98[0, 0, 0] : f32 from vector<1x1x1xf32>
      %c0_54 = arith.constant 0 : index
      %c0_55 = arith.constant 0 : index
      %100 = vector.load %arg18[%c0_54, %c0_55] : memref<1x8xf32, #tpu.memory_space<vmem>>, vector<1x8xf32>
      %101 = vector.shape_cast %100 : vector<1x8xf32> to vector<1x1x8xf32>
      %cst_56 = arith.constant dense<0.000000e+00> : vector<1xf32>
      %102 = vector.multi_reduction <add>, %101, %cst_56 [1, 2] : vector<1x1x8xf32> to vector<1xf32>
      %103 = vector.shape_cast %102 : vector<1xf32> to vector<1x1x1xf32>
      %104 = vector.extract %103[0, 0, 0] : f32 from vector<1x1x1xf32>
      %105 = tpu.iota {dimensions = array<i32: 0>} : vector<8x128xi32>
      %106 = tpu.iota {dimensions = array<i32: 1>} : vector<8x128xi32>
      %c0_i32_57 = arith.constant 0 : i32
      %107 = vector.broadcast %c0_i32_57 : i32 to vector<8x128xi32>
      %108 = arith.cmpi eq, %105, %107 : vector<8x128xi32>
      %c0_i32_58 = arith.constant 0 : i32
      %109 = vector.broadcast %c0_i32_58 : i32 to vector<8x128xi32>
      %110 = arith.cmpi eq, %106, %109 : vector<8x128xi32>
      %111 = arith.andi %108, %110 : vector<8x128xi1>
      %cst_59 = arith.constant 0.000000e+00 : f32
      %112 = vector.broadcast %89 : f32 to vector<8x128xf32>
      %113 = vector.broadcast %cst_59 : f32 to vector<8x128xf32>
      %114 = arith.select %111, %112, %113 : vector<8x128xi1>, vector<8x128xf32>
      %c1_i32_60 = arith.constant 1 : i32
      %115 = vector.broadcast %c1_i32_60 : i32 to vector<8x128xi32>
      %116 = arith.cmpi eq, %106, %115 : vector<8x128xi32>
      %117 = arith.andi %108, %116 : vector<8x128xi1>
      %cst_61 = arith.constant 0.000000e+00 : f32
      %118 = vector.broadcast %94 : f32 to vector<8x128xf32>
      %119 = vector.broadcast %cst_61 : f32 to vector<8x128xf32>
      %120 = arith.select %117, %118, %119 : vector<8x128xi1>, vector<8x128xf32>
      %121 = arith.addf %114, %120 : vector<8x128xf32>
      %c2_i32 = arith.constant 2 : i32
      %122 = vector.broadcast %c2_i32 : i32 to vector<8x128xi32>
      %123 = arith.cmpi eq, %106, %122 : vector<8x128xi32>
      %124 = arith.andi %108, %123 : vector<8x128xi1>
      %cst_62 = arith.constant 0.000000e+00 : f32
      %125 = vector.broadcast %99 : f32 to vector<8x128xf32>
      %126 = vector.broadcast %cst_62 : f32 to vector<8x128xf32>
      %127 = arith.select %124, %125, %126 : vector<8x128xi1>, vector<8x128xf32>
      %128 = arith.addf %121, %127 : vector<8x128xf32>
      %c3_i32 = arith.constant 3 : i32
      %129 = vector.broadcast %c3_i32 : i32 to vector<8x128xi32>
      %130 = arith.cmpi eq, %106, %129 : vector<8x128xi32>
      %131 = arith.andi %108, %130 : vector<8x128xi1>
      %cst_63 = arith.constant 0.000000e+00 : f32
      %132 = vector.broadcast %104 : f32 to vector<8x128xf32>
      %133 = vector.broadcast %cst_63 : f32 to vector<8x128xf32>
      %134 = arith.select %131, %132, %133 : vector<8x128xi1>, vector<8x128xf32>
      %135 = arith.addf %128, %134 : vector<8x128xf32>
      %c0_64 = arith.constant 0 : index
      %c0_65 = arith.constant 0 : index
      %136 = vector.load %arg14[%c0_64, %c0_65] : memref<8x128xf32, #tpu.memory_space<vmem>>, vector<8x128xf32>
      tpu.vector_store %arg14[%c0_64, %c0_65], %135 {strides = array<i32>} : memref<8x128xf32, #tpu.memory_space<vmem>>, vector<8x128xf32>,
    } else {
    }
    return
  }
  func.func @transform_0(%arg0: i32, %arg1: i32, %arg2: memref<1xi32, #tpu.memory_space<smem>>, %arg3: memref<1xi32, #tpu.memory_space<smem>>, %arg4: memref<1xi32, #tpu.memory_space<smem>>) -> (i32, i32) {
    %c1_i32 = arith.constant 1 : i32
    %0 = arith.muli %arg0, %c1_i32 : i32
    %1 = arith.addi %0, %arg1 : i32
    %2 = arith.index_cast %1 : i32 to index
    %3 = memref.load %arg2[%2] : memref<1xi32, #tpu.memory_space<smem>>
    %c0_i32 = arith.constant 0 : i32
    %c0_i32_0 = arith.constant 0 : i32
    return %3, %c0_i32 : i32, i32
  }
  func.func @transform_1(%arg0: i32, %arg1: i32, %arg2: memref<1xi32, #tpu.memory_space<smem>>, %arg3: memref<1xi32, #tpu.memory_space<smem>>, %arg4: memref<1xi32, #tpu.memory_space<smem>>) -> (i32, i32) {
    %c1_i32 = arith.constant 1 : i32
    %0 = arith.muli %arg0, %c1_i32 : i32
    %1 = arith.addi %0, %arg1 : i32
    %2 = arith.index_cast %1 : i32 to index
    %3 = memref.load %arg3[%2] : memref<1xi32, #tpu.memory_space<smem>>
    %c0_i32 = arith.constant 0 : i32
    %c0_i32_0 = arith.constant 0 : i32
    return %3, %c0_i32 : i32, i32
  }
  func.func @transform_2(%arg0: i32, %arg1: i32, %arg2: memref<1xi32, #tpu.memory_space<smem>>, %arg3: memref<1xi32, #tpu.memory_space<smem>>, %arg4: memref<1xi32, #tpu.memory_space<smem>>) -> (i32, i32) {
    %c1_i32 = arith.constant 1 : i32
    %0 = arith.muli %arg0, %c1_i32 : i32
    %1 = arith.addi %0, %arg1 : i32
    %2 = arith.index_cast %1 : i32 to index
    %3 = memref.load %arg2[%2] : memref<1xi32, #tpu.memory_space<smem>>
    %c0_i32 = arith.constant 0 : i32
    %c0_i32_0 = arith.constant 0 : i32
    return %3, %c0_i32 : i32, i32
  }
  func.func @transform_3(%arg0: i32, %arg1: i32, %arg2: memref<1xi32, #tpu.memory_space<smem>>, %arg3: memref<1xi32, #tpu.memory_space<smem>>, %arg4: memref<1xi32, #tpu.memory_space<smem>>) -> (i32, i32) {
    %c1_i32 = arith.constant 1 : i32
    %0 = arith.muli %arg0, %c1_i32 : i32
    %1 = arith.addi %0, %arg1 : i32
    %2 = arith.index_cast %1 : i32 to index
    %3 = memref.load %arg3[%2] : memref<1xi32, #tpu.memory_space<smem>>
    %c0_i32 = arith.constant 0 : i32
    %c0_i32_0 = arith.constant 0 : i32
    return %c0_i32, %3 : i32, i32
  }
  func.func @transform_4(%arg0: i32, %arg1: i32, %arg2: memref<1xi32, #tpu.memory_space<smem>>, %arg3: memref<1xi32, #tpu.memory_space<smem>>, %arg4: memref<1xi32, #tpu.memory_space<smem>>) -> (i32, i32) {
    %c1_i32 = arith.constant 1 : i32
    %0 = arith.muli %arg0, %c1_i32 : i32
    %1 = arith.addi %0, %arg1 : i32
    %2 = arith.index_cast %1 : i32 to index
    %3 = memref.load %arg2[%2] : memref<1xi32, #tpu.memory_space<smem>>
    %c0_i32 = arith.constant 0 : i32
    %c0_i32_0 = arith.constant 0 : i32
    return %3, %c0_i32 : i32, i32
  }
  func.func @transform_5(%arg0: i32, %arg1: i32, %arg2: memref<1xi32, #tpu.memory_space<smem>>, %arg3: memref<1xi32, #tpu.memory_space<smem>>, %arg4: memref<1xi32, #tpu.memory_space<smem>>) -> (i32, i32) {
    %c1_i32 = arith.constant 1 : i32
    %0 = arith.muli %arg0, %c1_i32 : i32
    %1 = arith.addi %0, %arg1 : i32
    %2 = arith.index_cast %1 : i32 to index
    %3 = memref.load %arg3[%2] : memref<1xi32, #tpu.memory_space<smem>>
    %c0_i32 = arith.constant 0 : i32
    %c0_i32_0 = arith.constant 0 : i32
    return %c0_i32, %3 : i32, i32
  }
  func.func @transform_6(%arg0: i32, %arg1: i32, %arg2: memref<1xi32, #tpu.memory_space<smem>>, %arg3: memref<1xi32, #tpu.memory_space<smem>>, %arg4: memref<1xi32, #tpu.memory_space<smem>>) -> (i32, i32) {
    %c1_i32 = arith.constant 1 : i32
    %0 = arith.muli %arg0, %c1_i32 : i32
    %1 = arith.addi %0, %arg1 : i32
    %2 = arith.index_cast %1 : i32 to index
    %3 = memref.load %arg2[%2] : memref<1xi32, #tpu.memory_space<smem>>
    %c0_i32 = arith.constant 0 : i32
    %c0_i32_0 = arith.constant 0 : i32
    return %3, %c0_i32 : i32, i32
  }
  func.func @transform_7(%arg0: i32, %arg1: i32, %arg2: memref<1xi32, #tpu.memory_space<smem>>, %arg3: memref<1xi32, #tpu.memory_space<smem>>, %arg4: memref<1xi32, #tpu.memory_space<smem>>) -> (i32, i32) {
    %c1_i32 = arith.constant 1 : i32
    %0 = arith.muli %arg0, %c1_i32 : i32
    %1 = arith.addi %0, %arg1 : i32
    %2 = arith.index_cast %1 : i32 to index
    %3 = memref.load %arg3[%2] : memref<1xi32, #tpu.memory_space<smem>>
    %c0_i32 = arith.constant 0 : i32
    %c0_i32_0 = arith.constant 0 : i32
    return %c0_i32, %3 : i32, i32
  }
  func.func @transform_8(%arg0: i32, %arg1: i32, %arg2: memref<1xi32, #tpu.memory_space<smem>>, %arg3: memref<1xi32, #tpu.memory_space<smem>>, %arg4: memref<1xi32, #tpu.memory_space<smem>>) -> (i32, i32) {
    %c0_i32 = arith.constant 0 : i32
    %c0_i32_0 = arith.constant 0 : i32
    %c0_i32_1 = arith.constant 0 : i32
    return %c0_i32, %c0_i32_0 : i32, i32
  }
  func.func @transform_9(%arg0: i32, %arg1: i32, %arg2: memref<1xi32, #tpu.memory_space<smem>>, %arg3: memref<1xi32, #tpu.memory_space<smem>>, %arg4: memref<1xi32, #tpu.memory_space<smem>>) -> (i32, i32) {
    %c0_i32 = arith.constant 0 : i32
    %c0_i32_0 = arith.constant 0 : i32
    return %arg0, %c0_i32 : i32, i32
  }
}

</mosaic_0001>

<bundles_post_ra>
// kernel: tpu_custom_call.1
= control target key start
LH: loop header
LB: loop body
LE: loop exit
PB: predicated region body
PF: predicated region fallthrough
CT: control target
= control target key end

     0   :  { %20 = vsyncpa [#allocation11], 0  ;;  %v548_v0 = vmov 0   ;;  %vm224_vm0 = vcmask 261120   ;;  %vm211_vm1 = vcmask 57344   ;;  %v549_v5 = vmov 0.0   ;;  %s690_s0 = inlined_call_operand.<no memory space> [shape: s32[1], index: 0, kind: input, shape index: {}]   ;;  %s691_s1 = inlined_call_operand.<no memory space> [shape: s32[1], index: 1, kind: input, shape index: {}]   ;;  %s692_s2 = inlined_call_operand.<no memory space> [shape: s32[1], index: 2, kind: input, shape index: {}]   ;;  %s693_s3 = inlined_call_operand.vmem [shape: f32[8,32], index: 3, kind: input, shape index: {}]   ;;  %s694_s4 = inlined_call_operand.vmem [shape: f32[8,32], index: 4, kind: input, shape index: {}]   ;;  %s695_s5 = inlined_call_operand.vmem [shape: s32[8,1], index: 5, kind: input, shape index: {}]   ;;  %s696_s6 = inlined_call_operand.vmem [shape: s32[1,8], index: 6, kind: input, shape index: {}]   ;;  %s697_s7 = inlined_call_operand.vmem [shape: f32[8,1], index: 7, kind: input, shape index: {}]   ;;  %s698_s8 = inlined_call_operand.vmem [shape: f32[1,8], index: 8, kind: input, shape index: {}]   ;;  %s699_s9 = inlined_call_operand.vmem [shape: f32[8,1], index: 9, kind: input, shape index: {}]   ;;  %s700_s10 = inlined_call_operand.vmem [shape: f32[1,8], index: 10, kind: input, shape index: {}]   ;;  %s701_s11 = inlined_call_operand.vmem [shape: f32[8,8], index: 11, kind: input, shape index: {}]   ;;  %s702_s12 = inlined_call_operand.hbm [shape: f32[8,128], index: 12, kind: output, shape index: {}]  }
   0x1   :  { %p155_p0 = scmp.lt.s32.totalorder %s691_s1, 0  ;;  %p147_p1 = scmp.lt.s32.totalorder %s690_s0, 0  ;;  %517 = vset.pattern.permute.xlu0 %v548_v0  ;;  %212 = vst.msk [vmem:[#allocation2] sm:$0x1] %vm211_vm1, %v549_v5  ;;  %vm296_vm4 = vcmask 64512  }
   0x2   :  { %213 = vst.msk [vmem:[#allocation3] sm:$0x1] %vm211_vm1, %v549_v5  ;;  %p505_p2 = scmp.ne.s32.totalorder %s690_s0, %s691_s1 }
   0x3   :  { %s625_s10 = scalar_select %p155_p0, %s691_s1, 0  ;;  %214 = vst.msk [vmem:[#allocation4] sm:$0x1] %vm211_vm1, %v549_v5 }
   0x4   :  { %s148_s28 = scalar_select %p147_p1, %s690_s0, 0  ;;  %215 = vst.msk [vmem:[#allocation5] sm:$0x1] %vm211_vm1, %v549_v5 }
   0x5   :  { %s498_s29 = sshll.u32 %s625_s10, 3  ;;  %s188_s14 = scalar_lea.vmem %s698_s8, %s625_s10  ;;  %216 = vst [vmem:[#allocation10] sm:$0xff] %v549_v5 }
   0x6   :  { %s158_s17 = scalar_lea.vmem %s694_s4, %s498_s29  ;;  %s497_s18 = sshll.u32 %s148_s28, 3  ;;  %v518_v6 = vld [vmem:[%s188_s14] ss:$0 sm:$0xff] }
   0x7   :  { %v223_v1 = vld [vmem:[%s158_s17] sm:$0xff]  ;;  %s150_s21 = scalar_lea.vmem %s693_s3, %s497_s18  ;;  %s181_s24 = scalar_lea.vmem %s697_s7, %s497_s18 }
   0x8   :  { %501 = vmatpush.xpose.msk.msra.mxu0 %vm224_vm0, %v223_v1  ;;  %v222_v2 = vld [vmem:[%s150_s21] sm:$0xff]  ;;  %s173_s8 = scalar_lea.vmem %s696_s6, %s625_s10  ;;  %s166_s27 = scalar_lea.vmem %s695_s5, %s497_s18 }
   0x9   :  { %v251_v3 = vld [vmem:[%s181_s24] sm:$0xff]  ;;  %s218_s6 = scvt.s32.f32 %s692_s2 }
   0xa   :  { %255 = vperm.xlu0 %517, %v251_v3   ;;  %v280_v4 = vld [vmem:[%s166_s27] sm:$0xff] }
   0xb   :  { %502 = vmatmul.msk.f32.vlgmr.msra.gmra.mxu0 %vm224_vm0, %v222_v2  ;;  %v519_v20 = vld [vmem:[%s173_s8] ss:$0 sm:$0xff]  ;;  %v304_v52 = vstv %s218_s6  ;;  %v309_v62 = vld [vmem:[#allocation3] sm:$0x1]  ;;  %v320_v63 = vld [vmem:[#allocation4] sm:$0x1] }
   0xc   :  { %v295_v57 = vld [vmem:[#allocation2] sm:$0x1] }
  0x12   :  { %283 = vperm.xlu0 %517, %v280_v4   ;;  %v331_v4 = vld [vmem:[#allocation5] sm:$0x1] }
  0x7c   :  { %v256_v7 = vpop.permute.xlu0 %255 }
  0x7d   :  { %v261_v8 = vadd.f32 %v518_v6, %v256_v7 }
  0x84   :  { %v284_v22 = vpop.permute.xlu0 %283 }
  0x85   :  { %vm286_vm5 = vcmp.eq.s32.totalorder %v284_v22, %v519_v20 }
  0x88   :  { %v248_v9 = vpop.f32.mrf.mxu0 }
  0x89   :  { %v262_v10 = vmul.f32 2.0, %v248_v9 }
  0x8b   :  { %v263_v11 = vsub.f32 %v261_v8, %v262_v10 }
  0x8d   :  { %v264_v12 = vmax.f32 %v263_v11, 0.0 }
  0x8f   :  { %520 = vrsqrt.f32 %v264_v12  ;;  %vm272_vm2 = vcmp.eq.f32.partialorder %v264_v12, inf  ;;  %v275_v21 = vand.u32 2147483648, %v264_v12  ;;  %vm274_vm3 = vcmp.eq.f32.partialorder %v264_v12, 0.0 }
  0x95   :  { %v521_v13 = vpop.eup %520 }
  0x96   :  { %v266_v14 = vmul.f32 %v521_v13, %v264_v12 }
  0x98   :  { %v267_v15 = vmul.f32 %v521_v13, %v266_v14 }
  0x9a   :  { %v268_v16 = vmul.f32 0.5, %v267_v15 }
  0x9c   :  { %v269_v17 = vsub.f32 1.5, %v268_v16 }
  0x9e   :  { %v270_v18 = vmul.f32 %v521_v13, %v269_v17 }
  0xa0   :  { %v271_v19 = vmul.f32 %v270_v18, %v264_v12 }
  0xa2   :  { %v273_v23 = vsel %vm272_vm2, %v264_v12, %v271_v19 }
  0xa3   :  { %v276_v24 = vsel %vm274_vm3, %v275_v21, %v273_v23 }
  0xa4   :  { %v277_v25 = vmax.f32 %v276_v24, 0.0  ;;  %v278_v26 = vsub.f32 0.5, %v276_v24 }
  0xa6   :  { %v279_v27 = vmax.f32 %v278_v26, 0.0  ;;  %v287_v28 = vsel %vm286_vm5, %v277_v25, 0.0 }
  0xa7   :  { %vm289_vm6 = vcmp.gt.f32.partialorder %v287_v28, 0.0  ;;  %v297_v29 = vsel %vm296_vm4, %v287_v28, 0.0 }
  0xa8   :  { %v288_v30 = vsel %vm286_vm5, 0.0, %v279_v27  ;;  %v503_v31 = vsel %vm289_vm6, 1.0, %v549_v5  ;;  %v298_v32 = vrot.slane %v297_v29, 4 }
  0xa9   :  { %vm292_vm7 = vcmp.gt.f32.partialorder %v288_v30, 0.0  ;;  %v310_v33 = vsel %vm296_vm4, %v503_v31, 0.0  ;;  %v321_v34 = vsel %vm296_vm4, %v288_v30, 0.0 }
  0xaa   :  { %v504_v35 = vsel %vm292_vm7, 1.0, %v549_v5  ;;  %v299_v36 = vadd.f32 %v298_v32, %v297_v29  ;;  %v311_v37 = vrot.slane %v310_v33, 4  ;;  %v322_v38 = vrot.slane %v321_v34, 4 }
  0xab   :  { %v332_v39 = vsel %vm296_vm4, %v504_v35, 0.0 }
  0xac   :  { %v300_v40 = vrot.slane %v299_v36, 2  ;;  %v312_v41 = vadd.f32 %v311_v37, %v310_v33  ;;  %v323_v42 = vadd.f32 %v322_v38, %v321_v34  ;;  %v333_v43 = vrot.slane %v332_v39, 4 }
  0xae   :  { %v301_v44 = vadd.f32 %v300_v40, %v299_v36  ;;  %v313_v45 = vrot.slane %v312_v41, 2  ;;  %v324_v46 = vrot.slane %v323_v42, 2  ;;  %v334_v47 = vadd.f32 %v333_v43, %v332_v39 }
  0xb0   :  { %v302_v48 = vrot.slane %v301_v44, 1  ;;  %v314_v49 = vadd.f32 %v313_v45, %v312_v41  ;;  %v325_v50 = vadd.f32 %v324_v46, %v323_v42  ;;  %v335_v51 = vrot.slane %v334_v47, 2 }
  0xb2   :  { %v303_v53 = vadd.f32 %v302_v48, %v301_v44  ;;  %v315_v54 = vrot.slane %v314_v49, 1  ;;  %v326_v55 = vrot.slane %v325_v50, 1  ;;  %v336_v56 = vadd.f32 %v335_v51, %v334_v47 }
  0xb4   :  { %v305_v58 = vmul.f32 %v304_v52, %v303_v53  ;;  %v316_v59 = vadd.f32 %v315_v54, %v314_v49  ;;  %v327_v60 = vadd.f32 %v326_v55, %v325_v50  ;;  %v337_v61 = vrot.slane %v336_v56, 1 }
  0xb6   :  { %v306_v0 = vadd.f32 %v305_v58, %v295_v57  ;;  %v317_v1 = vmul.f32 %v316_v59, %v304_v52  ;;  %v328_v2 = vmul.f32 %v327_v60, %v304_v52  ;;  %v338_v3 = vadd.f32 %v337_v61, %v336_v56 }
  0xb8   :  { %308 = vst.msk [vmem:[#allocation2] sm:$0x1] %vm211_vm1, %v306_v0  ;;  %v318_v5 = vadd.f32 %v317_v1, %v309_v62  ;;  %v329_v6 = vadd.f32 %v328_v2, %v320_v63  ;;  %v339_v7 = vmul.f32 %v338_v3, %v304_v52  ;;  %344 = sbr.rel (%p505_p2) target bundleno = 211 (0xd3), region = 45 }
  0xba   :  { %319 = vst.msk [vmem:[#allocation3] sm:$0x1] %vm211_vm1, %v318_v5  ;;  %v340_v8 = vadd.f32 %v339_v7, %v331_v4 }
  0xbb   :  { %330 = vst.msk [vmem:[#allocation4] sm:$0x1] %vm211_vm1, %v329_v6 }
  0xbc   :  { %341 = vst.msk [vmem:[#allocation5] sm:$0x1] %vm211_vm1, %v340_v8 }
  0xbd   :  { %v345_v9 = vld [vmem:[%s701_s11] sm:$0xff] }
  0xbe   :  { %v347_v10 = vmul.f32 %v345_v9, %v287_v28  ;;  %v359_v11 = vmul.f32 %v503_v31, %v345_v9 }
  0xbf   :  { %v346_v26 = vld [vmem:[#allocation2] sm:$0x1] }
  0xc0   :  { %v348_v12 = vsel %vm296_vm4, %v347_v10, 0.0  ;;  %v360_v13 = vsel %vm296_vm4, %v359_v11, 0.0 }
  0xc1   :  { %v349_v14 = vrot.slane %v348_v12, 4  ;;  %v361_v15 = vrot.slane %v360_v13, 4  ;;  %v358_v27 = vld [vmem:[#allocation3] sm:$0x1] }
  0xc3   :  { %v350_v16 = vadd.f32 %v349_v14, %v348_v12  ;;  %v362_v17 = vadd.f32 %v361_v15, %v360_v13 }
  0xc5   :  { %v351_v18 = vrot.slane %v350_v16, 2  ;;  %v363_v19 = vrot.slane %v362_v17, 2 }
  0xc7   :  { %v352_v20 = vadd.f32 %v351_v18, %v350_v16  ;;  %v364_v21 = vadd.f32 %v363_v19, %v362_v17 }
  0xc9   :  { %v353_v22 = vrot.slane %v352_v20, 1  ;;  %v365_v23 = vrot.slane %v364_v21, 1 }
  0xcb   :  { %v354_v24 = vadd.f32 %v353_v22, %v352_v20  ;;  %v366_v25 = vadd.f32 %v365_v23, %v364_v21 }
  0xcd   :  { %v355_v28 = vmul.f32 %v354_v24, %v304_v52  ;;  %v367_v29 = vmul.f32 %v366_v25, %v304_v52 }
  0xcf   :  { %v356_v30 = vsub.f32 %v346_v26, %v355_v28  ;;  %v368_v31 = vsub.f32 %v358_v27, %v367_v29 }
  0xd1   :  { %357 = vst.msk [vmem:[#allocation2] sm:$0x1] %vm211_vm1, %v356_v30 }
  0xd2   :  { %369 = vst.msk [vmem:[#allocation3] sm:$0x1] %vm211_vm1, %v368_v31 }
  0xd3 PF:  { %v417_v4 = vlaneseq  ;;  %s550_s14 = smov [#allocation10]   ;;  %s449_s18 = sshll.u32 %s702_s12, 4  ;;  %s450_s18 = int_to_ptr.hbm [resolvable:$true] %s449_s18 }
  0xd4   :  { %s447_s15 = sshll.u32 %s550_s14, 4  ;;  %s448_s15 = int_to_ptr.vmem [resolvable:$true] %s447_s15 }
  0xd5   :  { %v418_v5 = vshrl.u32 %v417_v4, 7  ;;  %v420_v6 = vand.u32 127, %v417_v4 }
  0xd7   :  { %vm421_vm8 = vcmp.eq.s32.totalorder %v418_v5, 0  ;;  %vm422_vm9 = vcmp.eq.s32.totalorder %v420_v6, 0  ;;  %vm426_vm10 = vcmp.eq.s32.totalorder %v420_v6, 1  ;;  %vm431_vm12 = vcmp.eq.s32.totalorder %v420_v6, 2 }
  0xd8   :  { %v395_v32 = vld [vmem:[#allocation4] sm:$0x1]  ;;  %v373_v33 = vld [vmem:[#allocation2] sm:$0x1]  ;;  %vm423_vm11 = vmand %vm421_vm8, %vm422_vm9  ;;  %vm436_vm14 = vcmp.eq.s32.totalorder %v420_v6, 3 }
  0xd9   :  { %v396_v34 = vsel %vm211_vm1, %v395_v32, 0.0  ;;  %v374_v35 = vsel %vm211_vm1, %v373_v33, 0.0  ;;  %v406_v36 = vld [vmem:[#allocation5] sm:$0x1]  ;;  %v384_v37 = vld [vmem:[#allocation3] sm:$0x1]  ;;  %vm427_vm13 = vmand %vm421_vm8, %vm426_vm10 }
  0xda   :  { %397 = vadd.xlane.f32.xlu1 %v396_v34  ;;  %375 = vadd.xlane.f32.xlu0 %v374_v35  ;;  %v407_v38 = vsel %vm211_vm1, %v406_v36, 0.0  ;;  %v385_v39 = vsel %vm211_vm1, %v384_v37, 0.0  ;;  %vm432_vm15 = vmand %vm421_vm8, %vm431_vm12 }
  0xdb   :  { %vm437_vm0 = vmand %vm421_vm8, %vm436_vm14 }
  0xe2   :  { %408 = vadd.xlane.f32.xlu1 %v407_v38  ;;  %386 = vadd.xlane.f32.xlu0 %v385_v39 }
 0x14d   :  { %v398_v40 = vpop.xlane.xlu1 %397  ;;  %v376_v41 = vpop.xlane.xlu0 %375 }
 0x14e   :  { %v399_v42 = vrot.slane %v398_v40, 4  ;;  %v377_v43 = vrot.slane %v376_v41, 4 }
 0x150   :  { %v378_v44 = vadd.f32 %v377_v43, %v376_v41  ;;  %v400_v45 = vadd.f32 %v399_v42, %v398_v40 }
 0x152   :  { %v379_v46 = vrot.slane %v378_v44, 2  ;;  %v401_v48 = vrot.slane %v400_v45, 2 }
 0x154   :  { %v380_v47 = vadd.f32 %v379_v46, %v378_v44  ;;  %v402_v57 = vadd.f32 %v401_v48, %v400_v45 }
 0x155   :  { %v409_v49 = vpop.xlane.xlu1 %408  ;;  %v387_v50 = vpop.xlane.xlu0 %386 }
 0x156   :  { %v410_v51 = vrot.slane %v409_v49, 4  ;;  %v388_v52 = vrot.slane %v387_v50, 4  ;;  %v381_v53 = vrot.slane %v380_v47, 1  ;;  %v403_v62 = vrot.slane %v402_v57, 1 }
 0x158   :  { %v411_v54 = vadd.f32 %v410_v51, %v409_v49  ;;  %v389_v55 = vadd.f32 %v388_v52, %v387_v50  ;;  %v382_v56 = vadd.f32 %v381_v53, %v380_v47  ;;  %v404_v3 = vadd.f32 %v403_v62, %v402_v57 }
 0x15a   :  { %v412_v58 = vrot.slane %v411_v54, 2  ;;  %v390_v59 = vrot.slane %v389_v55, 2  ;;  %506 = vpush %v382_v56 }
 0x15c   :  { %v413_v60 = vadd.f32 %v412_v58, %v411_v54  ;;  %v391_v61 = vadd.f32 %v390_v59, %v389_v55 }
 0x15e   :  { %v392_v63 = vrot.slane %v391_v61, 1  ;;  %v414_v0 = vrot.slane %v413_v60, 1 }
 0x160   :  { %v393_v1 = vadd.f32 %v392_v63, %v391_v61  ;;  %v415_v2 = vadd.f32 %v414_v0, %v413_v60 }
 0x162   :  { %508 = vpush %v393_v1 }
 0x163   :  { %510 = vpush %v404_v3 }
 0x164   :  { %512 = vpush %v415_v2 }
 0x18b   :  { %s507_s0 = spop %506 }
 0x18c   :  { %v424_v7 = vstv %s507_s0 }
 0x18d   :  { %v425_v9 = vsel %vm423_vm11, %v424_v7, 0.0 }
 0x193   :  { %s509_s1 = spop %508 }
 0x194   :  { %v428_v8 = vstv %s509_s1  ;;  %s511_s11 = spop %510 }
 0x195   :  { %v429_v10 = vsel %vm427_vm13, %v428_v8, 0.0  ;;  %v433_v11 = vstv %s511_s11  ;;  %s513_s13 = spop %512 }
 0x196   :  { %v430_v12 = vadd.f32 %v429_v10, %v425_v9  ;;  %v438_v13 = vstv %s513_s13  ;;  %v434_v14 = vsel %vm432_vm15, %v433_v11, 0.0 }
 0x197   :  { %v439_v16 = vsel %vm437_vm0, %v438_v13, 0.0 }
 0x198   :  { %v435_v15 = vadd.f32 %v434_v14, %v430_v12 }
 0x19a   :  { %v440_v17 = vadd.f32 %v439_v16, %v435_v15 }
 0x19c   :  { %441 = vst [vmem:[#allocation10] sm:$0xff] %v440_v17 }
 0x19d   :  { %452 = dma.vmem_to_hbm [thread:$0]  %s448_s15, 128, %s450_s18, [#allocation11]  }
 0x19e   :  { %546 = dma.done.wait [#allocation11], 128  }
 0x19f   :  { %547 = vsyncadd [#allocation11], 4294967168 }
 0x1a0   :  { %457 = vsyncpa [#allocation11], 1 }

</bundles_post_ra>
